<compile_context>
chip_gen: v7x
topology: tpu7x:2x2x1
jax: 0.10.0
libtpu: 0.0.40
codegen_flags: <defaults>
</compile_context>

<pallas_src>
import jax
import jax.numpy as jnp
from jax.experimental import pallas as pl
from jax.experimental.pallas import tpu as pltpu


LANE = 128   # vreg lane width
SUB = 8      # sublane tile

_CORE_PARALLEL = getattr(pltpu, "CORE_PARALLEL", None)
_ARBITRARY = getattr(pltpu, "ARBITRARY", "arbitrary")


def _chip_config():
    """Pick tiling / VMEM / core-split parameters from the TPU generation."""
    try:
        kind = jax.devices()[0].device_kind.lower()
    except Exception:  # no TPU visible; conservative defaults
        kind = ""
    is_v7 = ("v7" in kind) or ("7x" in kind)
    if is_v7:
        # 64 MiB VMEM per TensorCore, 2 TCs per chip.
        return {
            "nsplit": 2,
            "vmem_limit": 48 * 1024 * 1024,
            "data_budget": 36 * 1024 * 1024,
            "core_parallel": _CORE_PARALLEL is not None,
        }
    # v5e / v6e: single TensorCore, 128 MiB VMEM.
    return {
        "nsplit": 1,
        "vmem_limit": 64 * 1024 * 1024,
        "data_budget": 48 * 1024 * 1024,
        "core_parallel": False,
    }


def _make_sse_kernel(rows, tile_rows, inner_steps, need_mask, two_axes):
    """Sum of squared differences; partials land in a resident (8,128) block."""

    def kernel(x_ref, y_ref, o_ref):
        if two_axes:
            c = pl.program_id(0)          # core-parallel axis
            i = pl.program_id(1)          # reduction axis (sequential)
            blk = c * inner_steps + i
        else:
            i = pl.program_id(0)
            blk = i

        @pl.when(i == 0)
        def _init():
            o_ref[...] = jnp.zeros_like(o_ref)

        def accum(d):
            sq = d * d
            # Reduce the tile only down to one vreg shape (8, 128): pure VPU
            # adds.  The final cross-lane/sublane reduction happens once in
            # the wrapper.
            o_ref[...] += jnp.sum(sq.reshape(tile_rows // SUB, SUB, LANE), axis=0)

        if not need_mask:
            # All blocks are fully in range: pure sub/mul/add hot path.
            accum(x_ref[...].astype(jnp.float32) - y_ref[...].astype(jnp.float32))
        else:
            row0 = blk * tile_rows
            is_full = row0 + tile_rows <= rows

            @pl.when(is_full)
            def _fast():
                accum(x_ref[...].astype(jnp.float32)
                      - y_ref[...].astype(jnp.float32))

            @pl.when(jnp.logical_not(is_full))
            def _masked():
                # Only the last / clamped-duplicate block pays the mask cost.
                d = (x_ref[...].astype(jnp.float32)
                     - y_ref[...].astype(jnp.float32))
                rid = jax.lax.broadcasted_iota(jnp.int32, d.shape, 0)
                d = jnp.where(rid < (rows - row0), d, 0.0)
                accum(d)

    return kernel


def _sse_pallas(x2, y2, rows, tile_rows, cfg, allow_fusion):
    """Kernel-side sum((x2 - y2)^2) over a (rows, 128) slab (native dtype in)."""
    total_blocks = (rows + tile_rows - 1) // tile_rows
    nsplit = max(1, min(cfg["nsplit"], total_blocks))
    inner_steps = (total_blocks + nsplit - 1) // nsplit
    covered_rows = nsplit * inner_steps * tile_rows
    need_mask = covered_rows != rows
    last_block = total_blocks - 1
    two_axes = nsplit > 1

    if two_axes:
        # Clamp so a fully out-of-range block index never generates a DMA past
        # the array; clamped duplicate blocks are zeroed by the in-kernel mask.
        def in_map(c, i):
            return (jnp.minimum(c * inner_steps + i, last_block), 0)

        out_map = lambda c, i: (c, 0)
        grid = (nsplit, inner_steps)
    else:
        in_map = lambda i: (i, 0)
        out_map = lambda i: (0, 0)
        grid = (inner_steps,)

    kernel = _make_sse_kernel(rows, tile_rows, inner_steps, need_mask, two_axes)

    n_main = rows * LANE
    cost = pl.CostEstimate(
        flops=3 * n_main,
        transcendentals=0,
        bytes_accessed=n_main * (x2.dtype.itemsize + y2.dtype.itemsize)
        + nsplit * SUB * LANE * 4,
    )

    def call(dims):
        return pl.pallas_call(
            kernel,
            out_shape=jax.ShapeDtypeStruct((nsplit * SUB, LANE), jnp.float32),
            grid_spec=pltpu.PrefetchScalarGridSpec(
                num_scalar_prefetch=0,
                grid=grid,
                in_specs=[
                    pl.BlockSpec((tile_rows, LANE), in_map),
                    pl.BlockSpec((tile_rows, LANE), in_map),
                ],
                # Resident (8,128) accumulator block per core; lane-dense store.
                out_specs=pl.BlockSpec((SUB, LANE), out_map),
            ),
            compiler_params=pltpu.CompilerParams(
                dimension_semantics=dims,
                vmem_limit_bytes=cfg["vmem_limit"],
                allow_input_fusion=[True, True] if allow_fusion else None,
            ),
            cost_estimate=cost,
        )(x2, y2)

    if two_axes and cfg["core_parallel"]:
        try:
            # Genuinely shard the leading axis across v7x's two TensorCores.
            partials = call((_CORE_PARALLEL, _ARBITRARY))
        except Exception:
            partials = call(("parallel", "arbitrary"))
    elif two_axes:
        partials = call(("parallel", "arbitrary"))
    else:
        partials = call(("arbitrary",))

    return jnp.sum(partials)


def biased_mse_loss(inputs, targets, decay: float):
    """Exact equivalent of BiasedMSELoss(decay)(inputs, targets)."""
    assert inputs.shape == targets.shape
    n_elem = inputs.size
    cfg = _chip_config()

    # Native dtype throughout the HBM path: no wrapper-side upcast copies.
    x = inputs.reshape(-1)
    y = targets.reshape(-1)

    n_main = (n_elem // LANE) * LANE
    rows = n_main // LANE

    sse = jnp.float32(0.0)

    if rows > 0:
        needs_slice = n_main != n_elem
        xm = x if not needs_slice else x[:n_main]
        ym = y if not needs_slice else y[:n_main]
        x2 = xm.reshape(rows, LANE)
        y2 = ym.reshape(rows, LANE)

        # Row-tile sized from a VMEM data budget: 2 inputs x 2 pipeline
        # buffers in native dtype + ~3 f32-wide temporaries (d, sq, masked d)
        # per in-flight tile.  Keeps per-step pipeline overhead <10% while
        # staying well under the generation-specific vmem_limit.
        itemsize = max(x2.dtype.itemsize, y2.dtype.itemsize)
        bytes_per_row = LANE * (4 * itemsize + 3 * 4)
        cap = max(SUB, (cfg["data_budget"] // bytes_per_row) // SUB * SUB)
        rows_aligned = ((rows + SUB - 1) // SUB) * SUB
        tile_rows = min(cap, rows_aligned)

        sse = sse + _sse_pallas(x2, y2, rows, tile_rows, cfg,
                                allow_fusion=needs_slice)

    # Unaligned tail (< 128 elements): negligible work, plain jnp keeps the
    # kernel path free of any full-tensor pad/copy.
    if n_main != n_elem:
        td = x[n_main:].astype(jnp.float32) - y[n_main:].astype(jnp.float32)
        sse = sse + jnp.sum(td * td)

    mse = sse / jnp.float32(n_elem)

    # The module has no learnable parameters, so reg_loss == 0.0 identically.
    reg_loss = jnp.float32(0.0)
    return mse + jnp.float32(decay) * reg_loss


if __name__ == "__main__":
    key = jax.random.PRNGKey(0)
    k1, k2 = jax.random.split(key)
    # Small shapes consistent with a typical NCHW prediction / target pair.
    inputs = jax.random.normal(k1, (2, 4, 16, 16), dtype=jnp.float32)
    targets = jax.random.normal(k2, (2, 4, 16, 16), dtype=jnp.float32)
    decay = 0.01

    loss = biased_mse_loss(inputs, targets, decay)
    loss = jax.block_until_ready(loss)

    # Cross-check against plain JAX reference (summation order differs).
    ref = jnp.mean((inputs - targets) ** 2) + decay * 0.0
    assert jnp.allclose(loss, ref, rtol=1e-5, atol=1e-6), (loss, ref)

    print("KERNEL_OK")
</pallas_src>

<mosaic_0001>
module attributes {stable_mosaic.version = 11 : i64} {
  func.func @kernel(%arg0: i32, %arg1: memref<16x128xf32, #tpu.memory_space<vmem>>, %arg2: memref<16x128xf32, #tpu.memory_space<vmem>>, %arg3: memref<8x128xf32, #tpu.memory_space<vmem>>) attributes {dimension_semantics = [#tpu.dimension_semantics<arbitrary>], iteration_bounds = array<i64: 1>, scalar_prefetch = 0 : i64, scratch_operands = 0 : i64, tpu.core_type = #tpu.core_type<tc>, window_params = [{transform_indices = @transform_0, window_bounds = array<i64: 16, 128>}, {transform_indices = @transform_1, window_bounds = array<i64: 16, 128>}, {pipeline_mode = #tpu.pipeline_mode<synchronous>, transform_indices = @transform_2, window_bounds = array<i64: 8, 128>}]} {
    %c0_i32 = arith.constant 0 : i32
    %0 = arith.cmpi eq, %arg0, %c0_i32 : i32
    %1 = arith.extui %0 : i1 to i32
    %c0_i32_0 = arith.constant 0 : i32
    %2 = arith.cmpi ne, %1, %c0_i32_0 : i32
    scf.if %2 {
      %cst_8 = arith.constant 0.000000e+00 : f32
      %12 = vector.broadcast %cst_8 : f32 to vector<8x128xf32>
      %c0_9 = arith.constant 0 : index
      %c0_10 = arith.constant 0 : index
      %13 = vector.load %arg3[%c0_9, %c0_10] : memref<8x128xf32, #tpu.memory_space<vmem>>, vector<8x128xf32>
      tpu.vector_store %arg3[%c0_9, %c0_10], %12 {strides = array<i32>} : memref<8x128xf32, #tpu.memory_space<vmem>>, vector<8x128xf32>,
    } else {
    }
    %c0 = arith.constant 0 : index
    %c0_1 = arith.constant 0 : index
    %3 = vector.load %arg1[%c0, %c0_1] : memref<16x128xf32, #tpu.memory_space<vmem>>, vector<16x128xf32>
    %c0_2 = arith.constant 0 : index
    %c0_3 = arith.constant 0 : index
    %4 = vector.load %arg2[%c0_2, %c0_3] : memref<16x128xf32, #tpu.memory_space<vmem>>, vector<16x128xf32>
    %5 = arith.subf %3, %4 : vector<16x128xf32>
    %6 = arith.mulf %5, %5 : vector<16x128xf32>
    %c0_4 = arith.constant 0 : index
    %c0_5 = arith.constant 0 : index
    %7 = vector.load %arg3[%c0_4, %c0_5] : memref<8x128xf32, #tpu.memory_space<vmem>>, vector<8x128xf32>
    %8 = vector.shape_cast %6 : vector<16x128xf32> to vector<2x8x128xf32>
    %cst = arith.constant dense<0.000000e+00> : vector<8x128xf32>
    %9 = vector.multi_reduction <add>, %8, %cst [0] : vector<2x8x128xf32> to vector<8x128xf32>
    %10 = arith.addf %7, %9 : vector<8x128xf32>
    %c0_6 = arith.constant 0 : index
    %c0_7 = arith.constant 0 : index
    %11 = vector.load %arg3[%c0_6, %c0_7] : memref<8x128xf32, #tpu.memory_space<vmem>>, vector<8x128xf32>
    tpu.vector_store %arg3[%c0_6, %c0_7], %10 {strides = array<i32>} : memref<8x128xf32, #tpu.memory_space<vmem>>, vector<8x128xf32>,
    return
  }
  func.func @transform_0(%arg0: i32) -> (i32, i32) {
    %c0_i32 = arith.constant 0 : i32
    %c0_i32_0 = arith.constant 0 : i32
    return %arg0, %c0_i32 : i32, i32
  }
  func.func @transform_1(%arg0: i32) -> (i32, i32) {
    %c0_i32 = arith.constant 0 : i32
    %c0_i32_0 = arith.constant 0 : i32
    return %arg0, %c0_i32 : i32, i32
  }
  func.func @transform_2(%arg0: i32) -> (i32, i32) {
    %c0_i32 = arith.constant 0 : i32
    %c0_i32_0 = arith.constant 0 : i32
    %c0_i32_1 = arith.constant 0 : i32
    return %c0_i32, %c0_i32_0 : i32, i32
  }
}

</mosaic_0001>

<bundles_post_ra>
// kernel: tpu_custom_call.1
= control target key start
LH: loop header
LB: loop body
LE: loop exit
PB: predicated region body
PF: predicated region fallthrough
CT: control target
= control target key end

     0   :  { %7 = vsyncpa [#allocation3], 0  ;;  %s207_s0 = inlined_call_operand.hbm [shape: f32[16,128], index: 0, kind: input, shape index: {}]   ;;  %s208_s1 = inlined_call_operand.hbm [shape: f32[16,128], index: 1, kind: input, shape index: {}]   ;;  %s209_s2 = inlined_call_operand.hbm [shape: f32[8,128], index: 2, kind: output, shape index: {}]  }
   0x1   :  { %8 = vsyncpa [#allocation6], 0 }
   0x2   :  { %9 = vsyncpa [#allocation4], 0  ;;  %s151_s9 = smov [#allocation2]   ;;  %s79_s13 = scalar_lea.hbm %s207_s0, 256 }
   0x3   :  { %s15_s10 = sshll.u32 %s151_s9, 4  ;;  %p80_p0 = scmp.ne.s32.totalorder %s207_s0, %s79_s13  ;;  %s16_s10 = int_to_ptr.vmem [resolvable:$true] %s15_s10 }
   0x4   :  { %p83_p1 = scmp.lt.u32.totalorder %s79_s13, %s207_s0 }
   0x6   :  { %p85_p2 = pnand %p83_p1, %p80_p0 }
   0x8   :  { %88 = shalt.err (!%p85_p2)
}
   0x9   :  { %s89_s18 = scalar_lea.vmem %s16_s10, 256  ;;  %p94_p4 = scmp.lt.s32.totalorder %s16_s10, %s16_s10 }
   0xa   :  { %p90_p3 = scmp.ne.s32.totalorder %s16_s10, %s89_s18  ;;  %p95_p5 = scmp.lt.s32.totalorder %s89_s18, %s89_s18 }
   0xc   :  { %p96_p6 = por %p95_p5, %p94_p4 }
   0xe   :  { %p97_p7 = pnand %p96_p6, %p90_p3 }
  0x10   :  { %100 = shalt.err (!%p97_p7)
}
  0x11   :  { %s152_s19 = smov 128   ;;  %s153_s20 = smov 8  }
  0x12   :  { %21 = dma.hbm_to_vmem [thread:$0]  %s207_s0, 256, %s16_s10, [#allocation3], %s152_s19, %s152_s19, %s153_s20  }
  0x13   :  { %s154_s23 = smov [#allocation5]   ;;  %s101_s27 = scalar_lea.hbm %s208_s1, 256 }
  0x14   :  { %s27_s24 = sshll.u32 %s154_s23, 4  ;;  %p102_p8 = scmp.ne.s32.totalorder %s208_s1, %s101_s27  ;;  %s28_s24 = int_to_ptr.vmem [resolvable:$true] %s27_s24 }
  0x15   :  { %p105_p9 = scmp.lt.u32.totalorder %s101_s27, %s208_s1 }
  0x17   :  { %p107_p10 = pnand %p105_p9, %p102_p8 }
  0x19   :  { %110 = shalt.err (!%p107_p10)
}
  0x1a   :  { %s111_s4 = scalar_lea.vmem %s28_s24, 256  ;;  %p116_p12 = scmp.lt.s32.totalorder %s28_s24, %s28_s24 }
  0x1b   :  { %p112_p11 = scmp.ne.s32.totalorder %s28_s24, %s111_s4  ;;  %p117_p13 = scmp.lt.s32.totalorder %s111_s4, %s111_s4 }
  0x1d   :  { %p118_p0 = por %p117_p13, %p116_p12 }
  0x1f   :  { %p119_p1 = pnand %p118_p0, %p112_p11 }
  0x21   :  { %122 = shalt.err (!%p119_p1)
}
  0x22   :  { %33 = dma.hbm_to_vmem [thread:$0]  %s208_s1, 256, %s28_s24, [#allocation6], %s152_s19, %s152_s19, %s153_s20  }
  0x23   :  { %145 = dma.done.wait [#allocation3], 256  }
  0x24   :  { %146 = vsyncadd [#allocation3], 4294967040 }
  0x25   :  { %147 = dma.done.wait [#allocation6], 256  }
  0x26   :  { %148 = vsyncadd [#allocation6], 4294967040  ;;  %v45_v0 = vld [vmem:[#allocation2] sm:$0xff]  ;;  %v46_v1 = vld [vmem:[#allocation2 + $0x8] sm:$0xff]  ;;  %s155_s6 = smov [#allocation7]  }
  0x27   :  { %v47_v2 = vld [vmem:[#allocation5] sm:$0xff]  ;;  %v48_v3 = vld [vmem:[#allocation5 + $0x8] sm:$0xff]  ;;  %s63_s7 = sshll.u32 %s155_s6, 4  ;;  %s64_s7 = int_to_ptr.vmem [resolvable:$true] %s63_s7 }
  0x28   :  { %v49_v4 = vsub.f32 %v45_v0, %v47_v2  ;;  %v50_v5 = vsub.f32 %v46_v1, %v48_v3  ;;  %s123_s8 = scalar_lea.vmem %s64_s7, 128  ;;  %p128_p3 = scmp.lt.s32.totalorder %s64_s7, %s64_s7 }
  0x29   :  { %p124_p2 = scmp.ne.s32.totalorder %s64_s7, %s123_s8  ;;  %p129_p4 = scmp.lt.s32.totalorder %s123_s8, %s123_s8 }
  0x2a   :  { %v51_v6 = vmul.f32 %v49_v4, %v49_v4  ;;  %v52_v7 = vmul.f32 %v50_v5, %v50_v5 }
  0x2b   :  { %p130_p5 = por %p129_p4, %p128_p3 }
  0x2c   :  { %v54_v8 = vadd.f32 %v52_v7, %v51_v6 }
  0x2d   :  { %p131_p6 = pnand %p130_p5, %p124_p2 }
  0x2e   :  { %56 = vst [vmem:[#allocation7] sm:$0xff] %v54_v8 }
  0x2f   :  { %134 = shalt.err (!%p131_p6)
}
  0x30   :  { %s135_s10 = scalar_lea.hbm %s209_s2, 128 }
  0x31   :  { %p136_p7 = scmp.ne.s32.totalorder %s209_s2, %s135_s10  ;;  %p139_p8 = scmp.lt.u32.totalorder %s135_s10, %s209_s2 }
  0x33   :  { %p141_p9 = pnand %p139_p8, %p136_p7 }
  0x35   :  { %144 = shalt.err (!%p141_p9)
}
  0x36   :  { %66 = dma.vmem_to_hbm [thread:$0]  %s64_s7, 128, %s209_s2, [#allocation4]  }
  0x37   :  { %149 = dma.done.wait [#allocation4], 128  }
  0x38   :  { %150 = vsyncadd [#allocation4], 4294967168 }
  0x39   :  { %70 = vsyncpa [#allocation3], 1 }
  0x3a   :  { %71 = vsyncpa [#allocation6], 1 }
  0x3b   :  { %72 = vsyncpa [#allocation4], 1 }

</bundles_post_ra>
